<compile_context>
chip_gen: v7x
topology: tpu7x:2x2x1
jax: 0.10.0
libtpu: 0.0.40
codegen_flags: <defaults>
</compile_context>

<pallas_src>
import functools

import jax
import jax.numpy as jnp
from jax.experimental import pallas as pl
from jax.experimental.pallas import tpu as pltpu


def _round_up(x, m):
    return (x + m - 1) // m * m


def _vmem_capacity_bytes():
    """Physical per-core VMEM; falls back to the v7x 64 MiB floor."""
    try:
        info = pltpu.get_tpu_info()
        cap = getattr(info, "vmem_capacity_bytes", None)
        if cap:
            return int(cap)
    except Exception:
        pass
    return 64 * 1024 * 1024


# ---------------------------------------------------------------------------
# Fused single-pass kernel: squeeze + MLP + sSE + excite on a resident slab
# ---------------------------------------------------------------------------
def _fused_scse_kernel(x_ref, w1_ref, b1_ref, w2_ref, b2_ref, wsse_ref,
                       bsse_ref, o_ref, *, inv_hw):
    # x_ref   : (TB, Cp, HW)   input slab, resident in VMEM for this step
    # w1_ref  : (Crp, Cp), b1_ref: (Crp, 1)   fc1 (column-vector convention)
    # w2_ref  : (Cp, Crp), b2_ref: (Cp, 1)    fc2
    # wsse_ref: (1, Cp) f32                   1x1 conv weight as a row
    # bsse_ref: (1,)  f32 in SMEM             1x1 conv bias
    # o_ref   : (TB, Cp, HW)
    tb = x_ref.shape[0]

    # ---- squeeze: per-(batch, channel) means assembled as (Cp, TB) cols ----
    cols = []
    for t in range(tb):                       # tb is a small static int (<=8)
        xt32 = x_ref[t].astype(jnp.float32)                        # (Cp, HW)
        cols.append(jnp.sum(xt32, axis=-1, keepdims=True) * inv_hw)  # (Cp, 1)
    mean_ct = cols[0] if tb == 1 else jnp.concatenate(cols, axis=1)  # (Cp, TB)

    # ---- cSE MLP, batched across TB on the MXU -----------------------------
    h = jnp.dot(w1_ref[...], mean_ct, preferred_element_type=jnp.float32)
    h = jnp.maximum(h + b1_ref[...], 0.0)                            # (Crp, TB)
    g = jnp.dot(w2_ref[...], h, preferred_element_type=jnp.float32)
    gate_c = jax.nn.sigmoid(g + b2_ref[...])                         # (Cp, TB)

    # ---- excite: sSE channel contraction on MXU + elementwise max ----------
    w_row = wsse_ref[...]                                            # (1, Cp)
    bs = bsse_ref[0]
    for t in range(tb):
        xt32 = x_ref[t].astype(jnp.float32)                          # (Cp, HW)
        s = jnp.dot(w_row, xt32, preferred_element_type=jnp.float32)  # (1, HW)
        gate_s = jax.nn.sigmoid(s + bs)                              # (1, HW)
        gc = gate_c[:, t:t + 1]                                      # (Cp, 1)
        o_ref[t] = jnp.maximum(xt32 * gc, xt32 * gate_s).astype(o_ref.dtype)


# ---------------------------------------------------------------------------
# Fallback pass 1: spatial-sum sweep + TB-batched squeeze/excite MLP
# ---------------------------------------------------------------------------
def _channel_gate_kernel(x_ref, w1_ref, b1_ref, w2_ref, b2_ref, gate_ref, *,
                         inv_hw):
    # x_ref   : (TB, Cp, HW_TILE)
    # gate_ref: (TB, Cp, 1) f32 -- running spatial sum, overwritten with the
    #                              sigmoid channel gate on the last HW tile.
    j = pl.program_id(1)

    @pl.when(j == 0)
    def _init():
        gate_ref[...] = jnp.zeros_like(gate_ref)

    x = x_ref[...].astype(jnp.float32)
    gate_ref[...] += jnp.sum(x, axis=-1, keepdims=True)

    @pl.when(j == pl.num_programs(1) - 1)
    def _finalize():
        tb = gate_ref.shape[0]
        cols = [gate_ref[t] * inv_hw for t in range(tb)]             # (Cp, 1)
        mean_ct = cols[0] if tb == 1 else jnp.concatenate(cols, axis=1)
        h = jnp.dot(w1_ref[...], mean_ct, preferred_element_type=jnp.float32)
        h = jnp.maximum(h + b1_ref[...], 0.0)                        # (Crp, TB)
        g = jnp.dot(w2_ref[...], h, preferred_element_type=jnp.float32)
        g = jax.nn.sigmoid(g + b2_ref[...])                          # (Cp, TB)
        for t in range(tb):
            gate_ref[t] = g[:, t:t + 1]                              # (Cp, 1)


# ---------------------------------------------------------------------------
# Fallback pass 2: MXU sSE contraction + elementwise max, spatially tiled
# ---------------------------------------------------------------------------
def _excite_kernel(x_ref, gate_c_ref, wsse_ref, bsse_ref, o_ref):
    # x_ref: (TB, Cp, HW_TILE); gate_c_ref: (TB, Cp, 1); wsse_ref: (1, Cp)
    tb = x_ref.shape[0]
    w_row = wsse_ref[...]
    bs = bsse_ref[0]
    for t in range(tb):
        xt32 = x_ref[t].astype(jnp.float32)                          # (Cp, S)
        s = jnp.dot(w_row, xt32, preferred_element_type=jnp.float32)  # (1, S)
        gate_s = jax.nn.sigmoid(s + bs)
        gc = gate_c_ref[t]                                           # (Cp, 1)
        o_ref[t] = jnp.maximum(xt32 * gc, xt32 * gate_s).astype(o_ref.dtype)


# ---------------------------------------------------------------------------
# Wrapper
# ---------------------------------------------------------------------------
def channel_spatial_se(x, w1, b1, w2, b2, w_sse, b_sse, *,
                       fused=None, target_block_bytes=None):
    """ChannelSpatialSELayer forward (NCHW, PyTorch semantics).

    x      : (B, C, H, W)   (f32 or bf16; math is done in f32 in-kernel)
    w1, b1 : fc1 params, shapes (Cr, C), (Cr,)
    w2, b2 : fc2 params, shapes (C, Cr), (C,)
    w_sse  : 1x1 conv weight, shape (1, C, 1, 1)
    b_sse  : 1x1 conv bias, shape (1,)
    fused  : None=auto (fuse when the batch-tile slab fits VMEM),
             False=force the two-pass tiled fallback.
    """
    B, C, H, W = x.shape
    Cr = w1.shape[0]
    HW = H * W
    itemsize = jnp.dtype(x.dtype).itemsize
    f32 = jnp.float32

    vmem_cap = _vmem_capacity_bytes()
    vmem_limit = int(min(vmem_cap * 3 // 4, 100 * 1024 * 1024))

    # ---- channel padding (tiny weights always; x only if C % 8 != 0) --------
    Cp = _round_up(max(C, 8), 8)
    Crp = _round_up(max(Cr, 8), 8)

    w1p = jnp.pad(w1.astype(f32), ((0, Crp - Cr), (0, Cp - C)))       # (Crp, Cp)
    b1p = jnp.pad(b1.astype(f32).reshape(Cr, 1), ((0, Crp - Cr), (0, 0)))
    w2p = jnp.pad(w2.astype(f32), ((0, Cp - C), (0, Crp - Cr)))       # (Cp, Crp)
    b2p = jnp.pad(b2.astype(f32).reshape(C, 1), ((0, Cp - C), (0, 0)))
    wssep = jnp.pad(w_sse.astype(f32).reshape(1, C), ((0, 0), (0, Cp - C)))
    bsse = b_sse.astype(f32).reshape(1)

    x3 = x.reshape(B, C, HW)                      # free reshape (contiguous)

    # ======================= fused single-pass path ==========================
    def fused_need(tb):
        # 2x input + 2x output blocks (double-buffered) + in-kernel f32 temps.
        return (4 * tb * Cp * HW * itemsize
                + 3 * Cp * HW * 4
                + (1 << 20))

    tb_fused = 0
    if fused is not False:
        tb_cap = min(8, max(1, (B + 1) // 2))     # n_b >= 2 -> both v7x cores
        for tb in range(tb_cap, 0, -1):
            if B % tb == 0 and fused_need(tb) <= vmem_limit:
                tb_fused = tb
                break

    if tb_fused > 0:
        TB = tb_fused
        n_b = B // TB
        # Only pad channels of x when unaligned (zero-copy when C % 8 == 0).
        x3p = x3 if Cp == C else jnp.pad(x3, ((0, 0), (0, Cp - C), (0, 0)))

        out = pl.pallas_call(
            functools.partial(_fused_scse_kernel, inv_hw=1.0 / HW),
            out_shape=jax.ShapeDtypeStruct((B, Cp, HW), x.dtype),
            grid_spec=pltpu.PrefetchScalarGridSpec(
                num_scalar_prefetch=0,
                grid=(n_b,),
                in_specs=[
                    pl.BlockSpec((TB, Cp, HW), lambda i: (i, 0, 0)),   # x slab
                    pl.BlockSpec((Crp, Cp), lambda i: (0, 0)),         # fc1 w
                    pl.BlockSpec((Crp, 1), lambda i: (0, 0)),          # fc1 b
                    pl.BlockSpec((Cp, Crp), lambda i: (0, 0)),         # fc2 w
                    pl.BlockSpec((Cp, 1), lambda i: (0, 0)),           # fc2 b
                    pl.BlockSpec((1, Cp), lambda i: (0, 0)),           # w_sse
                    pl.BlockSpec(memory_space=pltpu.MemorySpace.SMEM), # b_sse
                ],
                out_specs=pl.BlockSpec((TB, Cp, HW), lambda i: (i, 0, 0)),
            ),
            compiler_params=pltpu.CompilerParams(
                dimension_semantics=("parallel",),
                vmem_limit_bytes=vmem_limit),
        )(x3p, w1p, b1p, w2p, b2p, wssep, bsse)

        if Cp != C:
            out = out[:, :C, :]
        return out.reshape(B, C, H, W)

    # ======================= two-pass tiled fallback ==========================
    if target_block_bytes is None:
        # generation-aware block size (bigger blocks on 128 MiB-VMEM chips)
        target_block_bytes = (6 << 20) if vmem_cap >= (96 << 20) else (4 << 20)

    hw128 = _round_up(HW, 128)
    hw_tile = max(128, (target_block_bytes // (Cp * itemsize)) // 128 * 128)
    hw_tile = min(hw_tile, hw128)
    HWp = _round_up(hw128, hw_tile)

    block_bytes = Cp * hw_tile * itemsize
    TB = int(min(B, 8, max(1, (B + 1) // 2),           # keep n_b >= 2 (v7x)
                 max(1, target_block_bytes // block_bytes)))
    Bp = _round_up(B, TB)

    n_b = Bp // TB
    n_hw = HWp // hw_tile

    if (Bp, Cp, HWp) != (B, C, HW):
        x3p = jnp.pad(x3, ((0, Bp - B), (0, Cp - C), (0, HWp - HW)))
    else:
        x3p = x3

    # ---- pass 1: per-batch channel gate --------------------------------------
    gate_c = pl.pallas_call(
        functools.partial(_channel_gate_kernel, inv_hw=1.0 / HW),
        out_shape=jax.ShapeDtypeStruct((Bp, Cp, 1), f32),
        grid_spec=pltpu.PrefetchScalarGridSpec(
            num_scalar_prefetch=0,
            grid=(n_b, n_hw),
            in_specs=[
                pl.BlockSpec((TB, Cp, hw_tile), lambda i, j: (i, 0, j)),  # x
                pl.BlockSpec((Crp, Cp), lambda i, j: (0, 0)),             # fc1 w
                pl.BlockSpec((Crp, 1), lambda i, j: (0, 0)),              # fc1 b
                pl.BlockSpec((Cp, Crp), lambda i, j: (0, 0)),             # fc2 w
                pl.BlockSpec((Cp, 1), lambda i, j: (0, 0)),               # fc2 b
            ],
            out_specs=pl.BlockSpec((TB, Cp, 1), lambda i, j: (i, 0, 0)),
        ),
        compiler_params=pltpu.CompilerParams(
            dimension_semantics=("parallel", "arbitrary"),
            vmem_limit_bytes=vmem_limit),
    )(x3p, w1p, b1p, w2p, b2p)

    # ---- pass 2: excitation + elementwise max --------------------------------
    out = pl.pallas_call(
        _excite_kernel,
        out_shape=jax.ShapeDtypeStruct((Bp, Cp, HWp), x.dtype),
        grid_spec=pltpu.PrefetchScalarGridSpec(
            num_scalar_prefetch=0,
            grid=(n_b, n_hw),
            in_specs=[
                pl.BlockSpec((TB, Cp, hw_tile), lambda i, j: (i, 0, j)),  # x
                pl.BlockSpec((TB, Cp, 1), lambda i, j: (i, 0, 0)),        # gate_c
                pl.BlockSpec((1, Cp), lambda i, j: (0, 0)),               # w_sse
                pl.BlockSpec(memory_space=pltpu.MemorySpace.SMEM),        # b_sse
            ],
            out_specs=pl.BlockSpec((TB, Cp, hw_tile), lambda i, j: (i, 0, j)),
        ),
        compiler_params=pltpu.CompilerParams(
            dimension_semantics=("parallel", "parallel"),
            vmem_limit_bytes=vmem_limit),
    )(x3p, gate_c, wssep, bsse)

    return out[:B, :C, :HW].reshape(B, C, H, W)


# ---------------------------------------------------------------------------
# Pure-JAX reference (matches the PyTorch forward semantics)
# ---------------------------------------------------------------------------
def _reference(x, w1, b1, w2, b2, w_sse, b_sse):
    B, C, H, W = x.shape
    xf = x.astype(jnp.float32)
    # cSE
    squeeze = xf.reshape(B, C, -1).mean(axis=2)                   # (B, C)
    fc1 = jnp.maximum(squeeze @ w1.T + b1, 0.0)                   # (B, Cr)
    fc2 = jax.nn.sigmoid(fc1 @ w2.T + b2)                         # (B, C)
    cse = xf * fc2[:, :, None, None]
    # sSE
    conv = jnp.einsum('bchw,oc->bohw', xf, w_sse.reshape(1, C)) \
        + b_sse.reshape(1, 1, 1, 1)
    sse = xf * jax.nn.sigmoid(conv)
    return jnp.maximum(cse, sse).astype(x.dtype)


if __name__ == "__main__":
    def run_case(key, B, C, H, W, reduction_ratio=2, **kw):
        Cr = max(1, C // reduction_ratio)
        k = jax.random.split(key, 7)
        x = jax.random.normal(k[0], (B, C, H, W), dtype=jnp.float32)
        w1 = jax.random.normal(k[1], (Cr, C), dtype=jnp.float32) * 0.5
        b1 = jax.random.normal(k[2], (Cr,), dtype=jnp.float32) * 0.1
        w2 = jax.random.normal(k[3], (C, Cr), dtype=jnp.float32) * 0.5
        b2 = jax.random.normal(k[4], (C,), dtype=jnp.float32) * 0.1
        w_sse = jax.random.normal(k[5], (1, C, 1, 1), dtype=jnp.float32) * 0.5
        b_sse = jax.random.normal(k[6], (1,), dtype=jnp.float32) * 0.1

        out = channel_spatial_se(x, w1, b1, w2, b2, w_sse, b_sse, **kw)
        out = jax.block_until_ready(out)

        ref = _reference(x, w1, b1, w2, b2, w_sse, b_sse)
        assert out.shape == (B, C, H, W)
        assert jnp.allclose(out, ref, atol=1e-4, rtol=1e-4), \
            f"mismatch vs reference for shape {(B, C, H, W)}"

    key = jax.random.PRNGKey(0)
    keys = jax.random.split(key, 4)
    # Primary small case consistent with the module spec (fused path, TB=1,
    # two grid steps -> both v7x cores busy).
    run_case(keys[0], B=2, C=4, H=16, W=16)
    # Unaligned C / HW, odd batch (fused path, ragged full-extent HW block).
    run_case(keys[1], B=3, C=6, H=9, W=9)
    # Aligned channels: zero-copy fused path packing TB=2 batch elems/block.
    run_case(keys[2], B=4, C=8, H=16, W=16)
    # Force the two-pass tiled fallback (multi-tile HW reduction sweep).
    run_case(keys[3], B=2, C=4, H=20, W=20, fused=False, target_block_bytes=4096)

    print("KERNEL_OK")
</pallas_src>

<mosaic_0001>
module attributes {stable_mosaic.version = 11 : i64} {
  func.func @_fused_scse_kernel(%arg0: i32, %arg1: memref<1x8x256xf32, #tpu.memory_space<vmem>>, %arg2: memref<8x8xf32, #tpu.memory_space<vmem>>, %arg3: memref<8x1xf32, #tpu.memory_space<vmem>>, %arg4: memref<8x8xf32, #tpu.memory_space<vmem>>, %arg5: memref<8x1xf32, #tpu.memory_space<vmem>>, %arg6: memref<1x8xf32, #tpu.memory_space<vmem>>, %arg7: memref<1xf32, #tpu.memory_space<smem>>, %arg8: memref<1x8x256xf32, #tpu.memory_space<vmem>>) attributes {dimension_semantics = [#tpu.dimension_semantics<parallel>], iteration_bounds = array<i64: 2>, scalar_prefetch = 0 : i64, scratch_operands = 0 : i64, tpu.core_type = #tpu.core_type<tc>, window_params = [{transform_indices = @transform_0, window_bounds = array<i64: 1, 8, 256>}, {pipeline_mode = #tpu.pipeline_mode<synchronous>, transform_indices = @transform_1, window_bounds = array<i64: 8, 8>}, {pipeline_mode = #tpu.pipeline_mode<synchronous>, transform_indices = @transform_2, window_bounds = array<i64: 8, 1>}, {pipeline_mode = #tpu.pipeline_mode<synchronous>, transform_indices = @transform_3, window_bounds = array<i64: 8, 8>}, {pipeline_mode = #tpu.pipeline_mode<synchronous>, transform_indices = @transform_4, window_bounds = array<i64: 8, 1>}, {pipeline_mode = #tpu.pipeline_mode<synchronous>, transform_indices = @transform_5, window_bounds = array<i64: 1, 8>}, {transform_indices = @transform_6, window_bounds = array<i64: 1>}, {transform_indices = @transform_7, window_bounds = array<i64: 1, 8, 256>}]} {
    %c0 = arith.constant 0 : index
    %c0_0 = arith.constant 0 : index
    %c0_1 = arith.constant 0 : index
    %0 = vector.load %arg1[%c0, %c0_0, %c0_1] : memref<1x8x256xf32, #tpu.memory_space<vmem>>, vector<1x8x256xf32>
    %1 = vector.shape_cast %0 : vector<1x8x256xf32> to vector<8x256xf32>
    %cst = arith.constant dense<0.000000e+00> : vector<8xf32>
    %2 = vector.multi_reduction <add>, %1, %cst [1] : vector<8x256xf32> to vector<8xf32>
    %3 = vector.shape_cast %2 : vector<8xf32> to vector<8x1xf32>
    %cst_2 = arith.constant 3.906250e-03 : f32
    %4 = vector.broadcast %cst_2 : f32 to vector<8x1xf32>
    %5 = arith.mulf %3, %4 : vector<8x1xf32>
    %c0_3 = arith.constant 0 : index
    %c0_4 = arith.constant 0 : index
    %6 = vector.load %arg2[%c0_3, %c0_4] : memref<8x8xf32, #tpu.memory_space<vmem>>, vector<8x8xf32>
    %cst_5 = arith.constant dense<0.000000e+00> : vector<8x1xf32>
    %7 = tpu.matmul %6, %5, %cst_5 {dimension_numbers = #tpu.dot_dimension_numbers<[1], [0], [0], [1], [0, 0, 1, 1], [], []>} : vector<8x8xf32>, vector<8x1xf32>, vector<8x1xf32> -> vector<8x1xf32>
    %c0_6 = arith.constant 0 : index
    %c0_7 = arith.constant 0 : index
    %8 = vector.load %arg3[%c0_6, %c0_7] : memref<8x1xf32, #tpu.memory_space<vmem>>, vector<8x1xf32>
    %9 = arith.addf %7, %8 : vector<8x1xf32>
    %cst_8 = arith.constant 0.000000e+00 : f32
    %10 = vector.broadcast %cst_8 : f32 to vector<8x1xf32>
    %11 = arith.maximumf %9, %10 : vector<8x1xf32>
    %c0_9 = arith.constant 0 : index
    %c0_10 = arith.constant 0 : index
    %12 = vector.load %arg4[%c0_9, %c0_10] : memref<8x8xf32, #tpu.memory_space<vmem>>, vector<8x8xf32>
    %cst_11 = arith.constant dense<0.000000e+00> : vector<8x1xf32>
    %13 = tpu.matmul %12, %11, %cst_11 {dimension_numbers = #tpu.dot_dimension_numbers<[1], [0], [0], [1], [0, 0, 1, 1], [], []>} : vector<8x8xf32>, vector<8x1xf32>, vector<8x1xf32> -> vector<8x1xf32>
    %c0_12 = arith.constant 0 : index
    %c0_13 = arith.constant 0 : index
    %14 = vector.load %arg5[%c0_12, %c0_13] : memref<8x1xf32, #tpu.memory_space<vmem>>, vector<8x1xf32>
    %15 = arith.addf %13, %14 : vector<8x1xf32>
    %16 = arith.negf %15 : vector<8x1xf32>
    %17 = math.exp %16 : vector<8x1xf32>
    %cst_14 = arith.constant 1.000000e+00 : f32
    %18 = vector.broadcast %cst_14 : f32 to vector<8x1xf32>
    %19 = arith.addf %18, %17 : vector<8x1xf32>
    %20 = arith.divf %18, %19 : vector<8x1xf32>
    %c0_15 = arith.constant 0 : index
    %c0_16 = arith.constant 0 : index
    %21 = vector.load %arg6[%c0_15, %c0_16] : memref<1x8xf32, #tpu.memory_space<vmem>>, vector<1x8xf32>
    %c0_17 = arith.constant 0 : index
    %22 = memref.load %arg7[%c0_17] : memref<1xf32, #tpu.memory_space<smem>>
    %c0_18 = arith.constant 0 : index
    %c0_19 = arith.constant 0 : index
    %c0_20 = arith.constant 0 : index
    %23 = vector.load %arg1[%c0_18, %c0_19, %c0_20] : memref<1x8x256xf32, #tpu.memory_space<vmem>>, vector<1x8x256xf32>
    %24 = vector.shape_cast %23 : vector<1x8x256xf32> to vector<8x256xf32>
    %cst_21 = arith.constant dense<0.000000e+00> : vector<1x256xf32>
    %25 = tpu.matmul %21, %24, %cst_21 {dimension_numbers = #tpu.dot_dimension_numbers<[1], [0], [0], [1], [0, 0, 1, 1], [], []>} : vector<1x8xf32>, vector<8x256xf32>, vector<1x256xf32> -> vector<1x256xf32>
    %26 = vector.broadcast %22 : f32 to vector<1x256xf32>
    %27 = arith.addf %25, %26 : vector<1x256xf32>
    %28 = arith.negf %27 : vector<1x256xf32>
    %29 = math.exp %28 : vector<1x256xf32>
    %cst_22 = arith.constant 1.000000e+00 : f32
    %30 = vector.broadcast %cst_22 : f32 to vector<1x256xf32>
    %31 = arith.addf %30, %29 : vector<1x256xf32>
    %32 = arith.divf %30, %31 : vector<1x256xf32>
    %33 = vector.broadcast %20 : vector<8x1xf32> to vector<8x256xf32>
    %34 = arith.mulf %24, %33 : vector<8x256xf32>
    %35 = vector.broadcast %32 : vector<1x256xf32> to vector<8x256xf32>
    %36 = arith.mulf %24, %35 : vector<8x256xf32>
    %37 = arith.maximumf %34, %36 : vector<8x256xf32>
    %c0_23 = arith.constant 0 : index
    %c0_24 = arith.constant 0 : index
    %c0_25 = arith.constant 0 : index
    %38 = vector.load %arg8[%c0_23, %c0_24, %c0_25] : memref<1x8x256xf32, #tpu.memory_space<vmem>>, vector<1x8x256xf32>
    %39 = vector.shape_cast %38 : vector<1x8x256xf32> to vector<8x256xf32>
    %40 = vector.shape_cast %37 : vector<8x256xf32> to vector<1x8x256xf32>
    tpu.vector_store %arg8[%c0_23, %c0_24, %c0_25], %40 {strides = array<i32>} : memref<1x8x256xf32, #tpu.memory_space<vmem>>, vector<1x8x256xf32>,
    return
  }
  func.func @transform_0(%arg0: i32) -> (i32, i32, i32) {
    %c0_i32 = arith.constant 0 : i32
    %c0_i32_0 = arith.constant 0 : i32
    %c0_i32_1 = arith.constant 0 : i32
    return %arg0, %c0_i32, %c0_i32_0 : i32, i32, i32
  }
  func.func @transform_1(%arg0: i32) -> (i32, i32) {
    %c0_i32 = arith.constant 0 : i32
    %c0_i32_0 = arith.constant 0 : i32
    %c0_i32_1 = arith.constant 0 : i32
    return %c0_i32, %c0_i32_0 : i32, i32
  }
  func.func @transform_2(%arg0: i32) -> (i32, i32) {
    %c0_i32 = arith.constant 0 : i32
    %c0_i32_0 = arith.constant 0 : i32
    %c0_i32_1 = arith.constant 0 : i32
    return %c0_i32, %c0_i32_0 : i32, i32
  }
  func.func @transform_3(%arg0: i32) -> (i32, i32) {
    %c0_i32 = arith.constant 0 : i32
    %c0_i32_0 = arith.constant 0 : i32
    %c0_i32_1 = arith.constant 0 : i32
    return %c0_i32, %c0_i32_0 : i32, i32
  }
  func.func @transform_4(%arg0: i32) -> (i32, i32) {
    %c0_i32 = arith.constant 0 : i32
    %c0_i32_0 = arith.constant 0 : i32
    %c0_i32_1 = arith.constant 0 : i32
    return %c0_i32, %c0_i32_0 : i32, i32
  }
  func.func @transform_5(%arg0: i32) -> (i32, i32) {
    %c0_i32 = arith.constant 0 : i32
    %c0_i32_0 = arith.constant 0 : i32
    %c0_i32_1 = arith.constant 0 : i32
    return %c0_i32, %c0_i32_0 : i32, i32
  }
  func.func @transform_6(%arg0: i32) -> i32 {
    %c0_i32 = arith.constant 0 : i32
    %c0_i32_0 = arith.constant 0 : i32
    return %c0_i32 : i32
  }
  func.func @transform_7(%arg0: i32) -> (i32, i32, i32) {
    %c0_i32 = arith.constant 0 : i32
    %c0_i32_0 = arith.constant 0 : i32
    %c0_i32_1 = arith.constant 0 : i32
    return %arg0, %c0_i32, %c0_i32_0 : i32, i32, i32
  }
}

</mosaic_0001>

<bundles_post_ra>
// kernel: tpu_custom_call.1
= control target key start
LH: loop header
LB: loop body
LE: loop exit
PB: predicated region body
PF: predicated region fallthrough
CT: control target
= control target key end

     0   :  { %s1091_s0 = inlined_call_operand.hbm [shape: f32[2,8,256], index: 0, kind: input, shape index: {}]   ;;  %s1092_s1 = inlined_call_operand.vmem [shape: f32[8,8], index: 1, kind: input, shape index: {}]   ;;  %s1093_s2 = inlined_call_operand.vmem [shape: f32[8,1], index: 2, kind: input, shape index: {}]   ;;  %s1094_s3 = inlined_call_operand.vmem [shape: f32[8,8], index: 3, kind: input, shape index: {}]   ;;  %s1095_s4 = inlined_call_operand.vmem [shape: f32[8,1], index: 4, kind: input, shape index: {}]   ;;  %s1096_s5 = inlined_call_operand.vmem [shape: f32[1,8], index: 5, kind: input, shape index: {}]   ;;  %s1097_s6 = inlined_call_operand.<no memory space> [shape: f32[1], index: 6, kind: input, shape index: {}]   ;;  %s1098_s7 = inlined_call_operand.hbm [shape: f32[2,8,256], index: 7, kind: output, shape index: {}]  }
   0x1   :  { %12 = sst [smem:[#allocation2]] %s1097_s6 }
   0x2   :  { %13 = vsyncpa [#allocation4], 0 }
   0x3   :  { %15 = vsyncpa [#allocation4 + $0x1], 0 }
   0x4   :  { %16 = vsyncpa [#allocation5], 0 }
   0x5   :  { %18 = vsyncpa [#allocation5 + $0x1], 0  ;;  %s899_s26 = smov 0   ;;  %s901_s27 = smov 0  }
   0x6   :  { %s903_s28 = smov 0   ;;  %s905_s29 = smov 0  }
   0x7 LB: > { %s920_s6 = sadd.s32 4294967295, %s849_s29   ;;  %s655_s30 = sadd.s32 4294967294, %s849_s29   ;;  %s849_s29 = sphi %s905_s29, %s1113_s29   ;;  %s845_s28 = sphi %s903_s28, %s1112_s28   ;;  %s841_s27 = sphi %s901_s27, %s1111_s27   ;;  %s837_s26 = sphi %s899_s26, %s1110_s26  }
   0x8   : > { %s924_s8 = sadd.s32 1, %s849_s29   ;;  %s31_s9 = sadd.s32 1, %s845_s28 }
   0x9   : > { %s28_s10 = ssub.s32 %s849_s29, %s924_s8  ;;  %p38_p0 = scmp.ne.s32.totalorder %s845_s28, %s841_s27 }
   0xa   : > { %p29_p1 = scmp.eq.s32.totalorder %s28_s10, 0  ;;  %p39_p2 = scmp.eq.s32.totalorder %s849_s29, 0 }
   0xb   : > { %p44_p3 = scmp.ne.s32.totalorder %s841_s27, %s837_s26  ;;  %p45_p4 = scmp.eq.s32.totalorder %s920_s6, 0 }
   0xc   : > { %s936_s11 = scalar_select %p29_p1, %s845_s28, %s31_s9  }
   0xd   : > { %p938_p5 = por %p39_p2, %p38_p0  ;;  %p942_p6 = por %p45_p4, %p44_p3 }
   0xe   : > { %p194_p7 = scmp.eq.s32.totalorder %s920_s6, 1  ;;  %p200_p8 = scmp.eq.s32.totalorder %s655_s30, 1 }
   0xf   : > { %p703_p10 = scmp.lt.s32.totalorder %s849_s29, 2  ;;  %s238_s16 = sand.u32 1, %s845_s28  }
  0x10   : > { %p949_p11 = por %p194_p7, %p38_p0  ;;  %p953_p12 = por %p200_p8, %p44_p3 }
  0x11   : > { %s675_s17 = sshll.u32 %s849_s29, 8  ;;  %s658_s18 = sshll.u32 %s238_s16, 4 }
  0x12   : > { %s1102_s14 = scalar_select %p949_p11, 1, 0 }
  0x13   : > { %s1103_s15 = scalar_select %p953_p12, 1, 0 }
  0x14   : > { %s962_s21 = scalar_lea.hbm %s1091_s0, %s675_s17  ;;  %s242_s22 = scalar_lea.vmem [#allocation3], %s658_s18 }
  0x15   : > { %s250_s23 = sshll.u32 %s242_s22, 4  ;;  %p966_p13 = pnand %p703_p10, %p938_p5  ;;  %s970_s23 = int_to_ptr.vmem [resolvable:$true] %s250_s23 }
  0x16   : > { %s239_s25 = scalar_lea.sflag [#allocation4], %s238_s16  ;;  %s753_s30 = scalar_lea.hbm %s962_s21, 256 }
  0x17   : > { %p754_p2 = scmp.ne.s32.totalorder %s962_s21, %s753_s30  ;;  %p755_p3 = pneg %p966_p13 }
  0x18   : > { %s758_s12 = scalar_lea.hbm %s1091_s0, 512  ;;  %p759_p5 = scmp.lt.u32.totalorder %s962_s21, %s1091_s0 }
  0x19   : > { %p756_p4 = pnand %p755_p3, %p754_p2  ;;  %p760_p8 = scmp.lt.u32.totalorder %s758_s12, %s753_s30 }
  0x1a   : > { %p762_p9 = scmp.lt.u32.totalorder %s753_s30, %s962_s21 }
  0x1b   : > { %p757_p7 = pneg %p756_p4  ;;  %p761_p10 = por %p760_p8, %p759_p5 }
  0x1d   : > { %p763_p0 = por %p762_p9, %p761_p10 }
  0x1f   : > { %p764_p1 = pnand %p763_p0, %p757_p7 }
  0x21   : > { %767 = shalt.err (!%p764_p1)
}
  0x22   : > { %s768_s16 = scalar_lea.vmem %s970_s23, 256  ;;  %s851_s19 = smov [#allocation3]  }
  0x23   : > { %p769_p2 = scmp.ne.s32.totalorder %s970_s23, %s768_s16  ;;  %s773_s20 = sshll.u32 %s851_s19, 4  ;;  %s774_s20 = int_to_ptr.vmem [resolvable:$false] %s773_s20 }
  0x24   : > { %s775_s22 = scalar_lea.vmem %s774_s20, 512  ;;  %p776_p11 = scmp.lt.s32.totalorder %s970_s23, %s774_s20 }
  0x25   : > { %p771_p4 = pnand %p769_p2, %p755_p3  ;;  %p777_p5 = scmp.lt.s32.totalorder %s775_s22, %s768_s16 }
  0x27   : > { %p772_p12 = pneg %p771_p4  ;;  %p778_p8 = por %p777_p5, %p776_p11 }
  0x29   : > { %p779_p9 = pnand %p778_p8, %p772_p12 }
  0x2b   : > { %782 = shalt.err (!%p779_p9)
}
  0x2c   : > { %698 = dma.hbm_to_vmem [thread:$0]  (!%p966_p13), %s962_s21, 256, %s970_s23, %s239_s25  }
  0x2d   : > { %p1105_p0 = scmp.lt.s32.totalorder %s849_s29, 3  ;;  %p1106_p1 = scmp.ge.s32.totalorder %s849_s29, 1 }
  0x2f   : > { %p256_p3 = pnand %p1106_p1, %p1105_p0 }
  0x30   : > { %s1004_s30 = sand.u32 (!%p256_p3), 1, %s841_s27  }
  0x31   : > { %259 = sbr.rel (%p256_p3) target bundleno = 808 (0x328), region = 48  ;;  %s662_s9 = sshll.u32 (!%p256_p3), %s1004_s30, 4 }
  0x32   : > { %s262_s10 = scalar_lea.sflag (!%p256_p3), [#allocation4], %s1004_s30  ;;  %s265_s24 = scalar_lea.vmem (!%p256_p3), [#allocation3], %s662_s9 }
  0x38   : > { %828 = dma.done.wait (%p942_p6), %s262_s10, 256  }
  0x39   : > { %830 = vsyncadd (%p942_p6), %s262_s10, 4294967040  ;;  %v1014_v0 = vld [vmem:[%s265_s24] sm:$0xff]  ;;  %v1016_v1 = vld [vmem:[%s265_s24 + $0x8] sm:$0xff]  ;;  %v852_v3 = vmov 0.0   ;;  %vm853_vm0 = vmmov 0   ;;  %vm304_vm1 = vcmask 64512   ;;  %v556_v34 = vlaneseq }
  0x3a   : > { %v298_v2 = vadd.f32 %v1016_v1, %v1014_v0  ;;  %681 = vmatprep.subr.mxu0 %v852_v3  ;;  %686 = vmatprep.subr.mxu1 %v852_v3  ;;  %v302_v6 = vld [vmem:[%s1092_s1] sm:$0xff]  ;;  %v854_v14 = vmov 0   ;;  %s461_s22 = sld [smem:[#allocation2]]  ;;  %s676_s10 = sshll.u32 %s920_s6, 8 }
  0x3b   : > { %683 = vmatprep.mubr.msk.f32.mxu0 %vm853_vm0, %v852_v3  ;;  %688 = vmatprep.mubr.msk.f32.mxu1 %vm853_vm0, %v852_v3  ;;  %v460_v7 = vld [vmem:[%s1096_s5] sm:$0x1]  ;;  %v557_v35 = vshrl.u32 %v556_v34, 7  ;;  %s295_s24 = scalar_lea.vmem [#allocation6], %s662_s9  ;;  %s1047_s25 = scalar_lea.hbm %s1098_s7, %s676_s10 }
  0x3c   : > { %299 = vadd.xlane.f32.xlu0 %v298_v2  ;;  %v303_v8 = vld [vmem:[%s1093_s2] sm:$0xff]  ;;  %s585_s21 = sshll.u32 %s295_s24, 4  ;;  %s571_s6 = scalar_lea.sflag [#allocation5], %s1004_s30  ;;  %s1049_s21 = int_to_ptr.vmem [resolvable:$true] %s585_s21 }
  0x3d   : > { %v379_v13 = vld [vmem:[%s1094_s3] sm:$0xff]  ;;  %740 = vset.pattern.permute.xlu0 %v854_v14  ;;  %v558_v37 = vsub.s32 0, %v557_v35  ;;  %s783_s9 = scalar_lea.vmem %s1049_s21, 256  ;;  %p1107_p11 = scmp.ne.s32.totalorder %s1102_s14, 0 }
  0x3e   : > { %v380_v17 = vld [vmem:[%s1095_s4] sm:$0xff]  ;;  %p784_p6 = scmp.ne.s32.totalorder %s1049_s21, %s783_s9  ;;  %s855_s12 = smov [#allocation6]  }
  0x3f   : > { %s787_s17 = sshll.u32 %s855_s12, 4  ;;  %s788_s17 = int_to_ptr.vmem [resolvable:$false] %s787_s17 }
  0x40   : > { %v462_v25 = vstv %s461_s22  ;;  %p785_p12 = pnand %p784_p6, %p1107_p11  ;;  %s789_s18 = scalar_lea.vmem %s788_s17, 512 }
  0x41   : > { %p790_p7 = scmp.lt.s32.totalorder %s1049_s21, %s788_s17  ;;  %p791_p10 = scmp.lt.s32.totalorder %s789_s18, %s783_s9 }
  0x42   : > { %p786_p13 = pneg %p785_p12 }
  0x43   : > { %p792_p2 = por %p791_p10, %p790_p7 }
  0x45   : > { %p793_p4 = pnand %p792_p2, %p786_p13 }
  0xc9   : > { %v300_v4 = vpop.xlane.xlu0 %299 }
  0xca   : > { %v301_v5 = vmul.f32 0.00390625, %v300_v4 }
  0xcc   : > { %682 = vmatpush3.msra.mxu0 %v301_v5 }
  0xcd   : > { %684 = vmatmul.mubr.msk.f32.vlgmr.msra.gmra.mrb[0].mxu0 %vm304_vm1, %v302_v6  ;;  %466 = vmatprep.subr.mxu0 %v1016_v1 }
  0xce   : > { %467 = vmatpush1.msra.mxu0 %v1014_v0  ;;  %530 = vmatprep.mubr.f32.mxu0 %v852_v3 }
  0xd1   : > { %667 = vmatmul.mubr.msk.f32.vlgmr.msra.gmra.mrb[2].mxu0 %vm304_vm1, %v460_v7 }
 0x1a0   : > { %v374_v9 = vpop.f32.mrb[0].mxu0 }
 0x1a1   : > { %v375_v10 = vadd.f32 %v374_v9, %v303_v8  ;;  %v685_v11 = vpop.f32.mrb[1].mxu0 }
 0x1a3   : > { %v378_v12 = vmax.f32 %v375_v10, 0.0 }
 0x1a4   : > { %v532_v15 = vpop.f32.mrb[2].mxu0 }
 0x1a5   : > { %687 = vmatpush3.msra.mxu1 %v378_v12  ;;  %v534_v16 = vpop.f32.mrb[3].mxu0  ;;  %v533_v26 = vadd.f32 %v532_v15, %v462_v25 }
 0x1a6   : > { %689 = vmatmul.mubr.msk.f32.vlgmr.msra.gmra.mrb[0].mxu1 %vm304_vm1, %v379_v13  ;;  %v535_v27 = vadd.f32 %v534_v16, %v462_v25 }
 0x1a7   : > { %v668_v28 = vmul.f32 -1.442695, %v533_v26 }
 0x1a8   : > { %v669_v29 = vmul.f32 -1.442695, %v535_v27 }
 0x279   : > { %v450_v18 = vpop.f32.mrb[0].mxu1 }
 0x27a   : > { %v451_v19 = vadd.f32 %v450_v18, %v380_v17  ;;  %v690_v20 = vpop.f32.mrb[1].mxu1 }
 0x27c   : > { %v666_v21 = vmul.f32 -1.442695, %v451_v19 }
 0x27e   : > { %741 = vpow2.f32 %v666_v21 }
 0x288   : > { %v742_v22 = vpop.eup %741 }
 0x289   : > { %v457_v23 = vadd.f32 1.0, %v742_v22 }
 0x28b   : > { %743 = vrcp.f32 %v457_v23 }
 0x28c   : > { %745 = vpow2.f32 %v668_v28 }
 0x28d   : > { %747 = vpow2.f32 %v669_v29 }
 0x295   : > { %v744_v24 = vpop.eup %743 }
 0x296   : > { %551 = vperm.xlu0 %740, %v744_v24   ;;  %v746_v30 = vpop.eup %745 }
 0x297   : > { %v748_v31 = vpop.eup %747  ;;  %v543_v32 = vadd.f32 1.0, %v746_v30 }
 0x298   : > { %v544_v33 = vadd.f32 1.0, %v748_v31 }
 0x299   : > { %749 = vrcp.f32 %v543_v32 }
 0x29a   : > { %751 = vrcp.f32 %v544_v33 }
 0x2a3   : > { %v750_v36 = vpop.eup %749 }
 0x2a4   : > { %v752_v38 = vpop.eup %751  ;;  %v559_v39 = vrot.slane %v750_v36, %v558_v37 }
 0x2a5   : > { %v563_v40 = vrot.slane %v752_v38, %v558_v37 }
 0x2a6   : > { %v564_v41 = vmul.f32 %v559_v39, %v1014_v0 }
 0x2a7   : > { %v565_v42 = vmul.f32 %v563_v40, %v1016_v1 }
 0x315   : > { %v552_v43 = vpop.permute.xlu0 %551 }
 0x316   : > { %v554_v44 = vmul.f32 %v552_v43, %v1014_v0  ;;  %v555_v45 = vmul.f32 %v552_v43, %v1016_v1 }
 0x318   : > { %v566_v46 = vmax.f32 %v554_v44, %v564_v41  ;;  %v567_v47 = vmax.f32 %v555_v45, %v565_v42 }
 0x31a   : > { %568 = vst [vmem:[%s295_s24] sm:$0xff] %v566_v46  ;;  %569 = vst [vmem:[%s295_s24 + $0x8] sm:$0xff] %v567_v47 }
 0x31b   : > { %796 = shalt.err (!%p793_p4)
}
 0x31c   : > { %s797_s30 = scalar_lea.hbm %s1047_s25, 256  ;;  %s801_s20 = scalar_lea.hbm %s1098_s7, 512 }
 0x31d   : > { %p798_p5 = scmp.ne.s32.totalorder %s1047_s25, %s797_s30  ;;  %p802_p0 = scmp.lt.u32.totalorder %s1047_s25, %s1098_s7 }
 0x31e   : > { %p803_p1 = scmp.lt.u32.totalorder %s801_s20, %s797_s30  ;;  %p805_p6 = scmp.lt.u32.totalorder %s797_s30, %s1047_s25 }
 0x31f   : > { %p799_p8 = pnand %p798_p5, %p1107_p11 }
 0x320   : > { %p804_p3 = por %p803_p1, %p802_p0 }
 0x321   : > { %p800_p9 = pneg %p799_p8 }
 0x322   : > { %p806_p12 = por %p805_p6, %p804_p3 }
 0x324   : > { %p807_p13 = pnand %p806_p12, %p800_p9 }
 0x326   : > { %810 = shalt.err (!%p807_p13)
}
 0x327   : > { %693 = dma.vmem_to_hbm [thread:$0]  (%p1107_p11), %s1049_s21, 256, %s1047_s25, %s571_s6  }
 0x328 PF: > { %s597_s24 = sand.u32 1, %s837_s26   ;;  %p1108_p7 = scmp.ne.s32.totalorder %s1103_s15, 0 }
 0x329   : > { %p1109_p10 = scmp.ge.s32.totalorder %s849_s29, 2  ;;  %s598_s23 = scalar_lea.sflag [#allocation5], %s597_s24 }
 0x32b   : > { %p700_p2 = pnand %p1109_p10, %p1108_p7 }
 0x32d   : > { %832 = dma.done.wait (!%p700_p2), %s598_s23, 256  }
 0x32e   : > { %834 = vsyncadd (!%p700_p2), %s598_s23, 4294967040  ;;  %p21_p4 = scmp.ge.s32.totalorder %s924_s8, 4   ;;  %s1110_s26 = smov %s841_s27 }
 0x32f   : > { %s1111_s27 = smov %s845_s28  ;;  %s1112_s28 = smov %s936_s11 }
 0x330   : > { %s1113_s29 = smov %s924_s8  ;;  %23 = sbr.rel (!%p21_p4) target bundleno = 7 (0x7), region = 93 }
 0x337   :  { %603 = vsyncpa [#allocation4], 1 }
 0x338   :  { %605 = vsyncpa [#allocation4 + $0x1], 1 }
 0x339   :  { %606 = vsyncpa [#allocation5], 1 }
 0x33a   :  { %608 = vsyncpa [#allocation5 + $0x1], 1 }

</bundles_post_ra>
